<compile_context>
chip_gen: v5e
topology: v5e:2x2
jax: 0.10.0
libtpu: 0.0.40
codegen_flags: <defaults>
</compile_context>

<pallas_src>
import functools

import numpy as np
import jax
import jax.numpy as jnp
from jax.experimental import pallas as pl
from jax.experimental.pallas import tpu as pltpu


def _rat_product_kernel(l_ref, r_ref, o_ref, *, C):
    """Lane-dense outer-sum ("product" in log space) hot path.

    l_ref, r_ref: (C, TN) VMEM tiles  -- channel on sublanes, flattened B*O on lanes.
    o_ref:        (C, C, TN) VMEM tile -- o_ref[i, j, n] = l_ref[i, n] + r_ref[j, n].
    """
    l = l_ref[...]                                   # (C, TN)
    r = r_ref[...]                                   # (C, TN)
    for i in range(C):                               # static, unrolled (C is small)
        # (1, TN) sublane-broadcast of left channel i against all right channels,
        # stored as one contiguous full-lane-width (C, TN) slab.
        o_ref[i] = l[i:i + 1, :] + r


def _round_up(v, m):
    return ((v + m - 1) // m) * m


def rat_product_forward(x, scopes):
    """RatProduct.forward.

    Args:
      x: [B, F, C] array.
      scopes: int array [2, O] of feature indices (index == F means padded row).

    Returns:
      [B, O, C*C] array.
    """
    B, F, C = x.shape
    O = int(scopes.shape[1])

    if F % 2 != 0:
        # Same as F.pad(x, pad=[0, 0, 0, 1]) in PyTorch (zero row for scope == F).
        x = jnp.pad(x, ((0, 0), (0, 1), (0, 0)))

    # Gather by scopes, flatten (B, O) -> N, and flip so N is the lane (minor) axis.
    # XLA fuses gather + pad + transpose into one small pass; inputs are only
    # 2*B*O*C elements vs the B*O*C^2 output, so this is cheap layout plumbing.
    left = x[:, scopes[0], :].reshape(B * O, C)      # (N, C)
    right = x[:, scopes[1], :].reshape(B * O, C)     # (N, C)
    N = B * O

    # Lane tile: target ~2 MiB output tiles, multiple of 128, clamped to [128, 32768].
    bytes_per = jnp.dtype(x.dtype).itemsize
    tn = ((2 << 20) // max(1, C * C * bytes_per)) // 128 * 128
    tn = max(128, min(32768, tn))
    tn = min(tn, _round_up(N, 128))
    Np = _round_up(N, tn)

    left_t = jnp.pad(left, ((0, Np - N), (0, 0))).T    # (C, Np)
    right_t = jnp.pad(right, ((0, Np - N), (0, 0))).T  # (C, Np)

    out_t = pl.pallas_call(
        functools.partial(_rat_product_kernel, C=C),
        out_shape=jax.ShapeDtypeStruct((C, C, Np), x.dtype),
        grid=(Np // tn,),
        in_specs=[
            pl.BlockSpec((C, tn), lambda t: (0, t)),
            pl.BlockSpec((C, tn), lambda t: (0, t)),
        ],
        out_specs=pl.BlockSpec((C, C, tn), lambda t: (0, 0, t)),
        compiler_params=pltpu.CompilerParams(
            dimension_semantics=("parallel",)),
    )(left_t, right_t)

    # (C, C, Np) -> (Np, C, C) -> drop lane padding -> (B, O, C*C).
    out = jnp.transpose(out_t, (2, 0, 1))[:N].reshape(B, O, C * C)
    return out


def build_scopes(in_features, cardinality=2, seed=0):
    """Deterministic replica of RatProduct.__init__ scope construction."""
    rng = np.random.default_rng(seed)
    perm = rng.permutation(in_features)
    scopes = [[] for _ in range(cardinality)]
    for i in range(0, in_features, cardinality):
        for j in range(cardinality):
            if i + j < in_features:
                scopes[j].append(int(perm[i + j]))
            else:
                scopes[j].append(in_features)  # points at the zero-padded row
    return np.array(scopes, dtype=np.int32)


if __name__ == "__main__":
    # Small shapes consistent with the module: batch=2, in_features=9 (odd, to
    # exercise the padding path), channel=4.
    B, F, C = 2, 9, 4
    cardinality = 2
    O = int(np.ceil(F / cardinality))

    scopes = build_scopes(F, cardinality, seed=0)   # [2, O]

    key = jax.random.PRNGKey(0)
    x = jax.random.normal(key, (B, F, C), dtype=jnp.float32)

    out = rat_product_forward(x, scopes)
    out = jax.block_until_ready(out)

    # Pure-JAX reference for correctness.
    x_p = jnp.pad(x, ((0, 0), (0, 1), (0, 0)))
    left = x_p[:, scopes[0], :][:, :, :, None]      # [B, O, C, 1]
    right = x_p[:, scopes[1], :][:, :, None, :]     # [B, O, 1, C]
    ref = (left + right).reshape(B, O, C * C)

    assert out.shape == (B, O, C * C), out.shape
    np.testing.assert_allclose(np.asarray(out), np.asarray(ref), rtol=1e-6, atol=1e-6)

    print("KERNEL_OK")
</pallas_src>

<mosaic_0001>
module attributes {stable_mosaic.version = 11 : i64} {
  func.func @_rat_product_kernel(%arg0: i32, %arg1: memref<4x128xf32, #tpu.memory_space<vmem>>, %arg2: memref<4x128xf32, #tpu.memory_space<vmem>>, %arg3: memref<4x4x128xf32, #tpu.memory_space<vmem>>) attributes {dimension_semantics = [#tpu.dimension_semantics<parallel>], iteration_bounds = array<i64: 1>, scalar_prefetch = 0 : i64, scratch_operands = 0 : i64, tpu.core_type = #tpu.core_type<tc>, window_params = [{transform_indices = @transform_0, window_bounds = array<i64: 4, 128>}, {transform_indices = @transform_1, window_bounds = array<i64: 4, 128>}, {transform_indices = @transform_2, window_bounds = array<i64: 4, 4, 128>}]} {
    %c0 = arith.constant 0 : index
    %c0_0 = arith.constant 0 : index
    %0 = vector.load %arg1[%c0, %c0_0] : memref<4x128xf32, #tpu.memory_space<vmem>>, vector<4x128xf32>
    %c0_1 = arith.constant 0 : index
    %c0_2 = arith.constant 0 : index
    %1 = vector.load %arg2[%c0_1, %c0_2] : memref<4x128xf32, #tpu.memory_space<vmem>>, vector<4x128xf32>
    %2 = vector.extract_strided_slice %0 {offsets = [0, 0], sizes = [1, 128], strides = [1, 1]} : vector<4x128xf32> to vector<1x128xf32>
    %3 = vector.broadcast %2 : vector<1x128xf32> to vector<4x128xf32>
    %4 = arith.addf %3, %1 : vector<4x128xf32>
    %c0_3 = arith.constant 0 : index
    %c0_4 = arith.constant 0 : index
    %c0_5 = arith.constant 0 : index
    %5 = vector.load %arg3[%c0_3, %c0_4, %c0_5] : memref<4x4x128xf32, #tpu.memory_space<vmem>>, vector<1x4x128xf32>
    %6 = vector.shape_cast %5 : vector<1x4x128xf32> to vector<4x128xf32>
    %7 = vector.shape_cast %4 : vector<4x128xf32> to vector<1x4x128xf32>
    tpu.vector_store %arg3[%c0_3, %c0_4, %c0_5], %7 {strides = array<i32>} : memref<4x4x128xf32, #tpu.memory_space<vmem>>, vector<1x4x128xf32>,
    %8 = vector.extract_strided_slice %0 {offsets = [1, 0], sizes = [1, 128], strides = [1, 1]} : vector<4x128xf32> to vector<1x128xf32>
    %9 = vector.broadcast %8 : vector<1x128xf32> to vector<4x128xf32>
    %10 = arith.addf %9, %1 : vector<4x128xf32>
    %c1 = arith.constant 1 : index
    %c0_6 = arith.constant 0 : index
    %c0_7 = arith.constant 0 : index
    %11 = vector.load %arg3[%c1, %c0_6, %c0_7] : memref<4x4x128xf32, #tpu.memory_space<vmem>>, vector<1x4x128xf32>
    %12 = vector.shape_cast %11 : vector<1x4x128xf32> to vector<4x128xf32>
    %13 = vector.shape_cast %10 : vector<4x128xf32> to vector<1x4x128xf32>
    tpu.vector_store %arg3[%c1, %c0_6, %c0_7], %13 {strides = array<i32>} : memref<4x4x128xf32, #tpu.memory_space<vmem>>, vector<1x4x128xf32>,
    %14 = vector.extract_strided_slice %0 {offsets = [2, 0], sizes = [1, 128], strides = [1, 1]} : vector<4x128xf32> to vector<1x128xf32>
    %15 = vector.broadcast %14 : vector<1x128xf32> to vector<4x128xf32>
    %16 = arith.addf %15, %1 : vector<4x128xf32>
    %c2 = arith.constant 2 : index
    %c0_8 = arith.constant 0 : index
    %c0_9 = arith.constant 0 : index
    %17 = vector.load %arg3[%c2, %c0_8, %c0_9] : memref<4x4x128xf32, #tpu.memory_space<vmem>>, vector<1x4x128xf32>
    %18 = vector.shape_cast %17 : vector<1x4x128xf32> to vector<4x128xf32>
    %19 = vector.shape_cast %16 : vector<4x128xf32> to vector<1x4x128xf32>
    tpu.vector_store %arg3[%c2, %c0_8, %c0_9], %19 {strides = array<i32>} : memref<4x4x128xf32, #tpu.memory_space<vmem>>, vector<1x4x128xf32>,
    %20 = vector.extract_strided_slice %0 {offsets = [3, 0], sizes = [1, 128], strides = [1, 1]} : vector<4x128xf32> to vector<1x128xf32>
    %21 = vector.broadcast %20 : vector<1x128xf32> to vector<4x128xf32>
    %22 = arith.addf %21, %1 : vector<4x128xf32>
    %c3 = arith.constant 3 : index
    %c0_10 = arith.constant 0 : index
    %c0_11 = arith.constant 0 : index
    %23 = vector.load %arg3[%c3, %c0_10, %c0_11] : memref<4x4x128xf32, #tpu.memory_space<vmem>>, vector<1x4x128xf32>
    %24 = vector.shape_cast %23 : vector<1x4x128xf32> to vector<4x128xf32>
    %25 = vector.shape_cast %22 : vector<4x128xf32> to vector<1x4x128xf32>
    tpu.vector_store %arg3[%c3, %c0_10, %c0_11], %25 {strides = array<i32>} : memref<4x4x128xf32, #tpu.memory_space<vmem>>, vector<1x4x128xf32>,
    return
  }
  func.func @transform_0(%arg0: i32) -> (i32, i32) {
    %c0_i32 = arith.constant 0 : i32
    %c0_i32_0 = arith.constant 0 : i32
    return %c0_i32, %arg0 : i32, i32
  }
  func.func @transform_1(%arg0: i32) -> (i32, i32) {
    %c0_i32 = arith.constant 0 : i32
    %c0_i32_0 = arith.constant 0 : i32
    return %c0_i32, %arg0 : i32, i32
  }
  func.func @transform_2(%arg0: i32) -> (i32, i32, i32) {
    %c0_i32 = arith.constant 0 : i32
    %c0_i32_0 = arith.constant 0 : i32
    %c0_i32_1 = arith.constant 0 : i32
    return %c0_i32, %c0_i32_0, %arg0 : i32, i32, i32
  }
}

</mosaic_0001>

<bundles_post_ra>
// kernel: tpu_custom_call.1
= control target key start
LH: loop header
LB: loop body
LE: loop exit
PB: predicated region body
PF: predicated region fallthrough
CT: control target
= control target key end

     0   :  { %7 = vsyncpa [#allocation3], 0  ;;  %s189_s0 = inlined_call_operand.hbm [shape: f32[4,128], index: 0, kind: input, shape index: {}]   ;;  %s190_s1 = inlined_call_operand.hbm [shape: f32[4,128], index: 1, kind: input, shape index: {}]   ;;  %s191_s2 = inlined_call_operand.hbm [shape: f32[4,4,128], index: 2, kind: output, shape index: {}]  }
   0x1   :  { %8 = vsyncpa [#allocation6], 0 }
   0x2   :  { %9 = vsyncpa [#allocation4], 0  ;;  %s15_s11 = sshll.u32 %s189_s0, 4  ;;  %s160_s12 = smov [#allocation2]   ;;  %s16_s11 = int_to_ptr.hbm [resolvable:$true] %s15_s11 }
   0x3   :  { %s17_s13 = sshll.u32 %s160_s12, 4  ;;  %s26_s16 = sshll.u32 %s190_s1, 4  ;;  %s18_s13 = int_to_ptr.vmem [resolvable:$true] %s17_s13  ;;  %s27_s16 = int_to_ptr.hbm [resolvable:$true] %s26_s16 }
   0x4   :  { %20 = dma.hbm_to_vmem [thread:$0]  %s16_s11, 64, %s18_s13, [#allocation3]  }
   0x5   :  { %s161_s17 = smov [#allocation5]  }
   0x6   :  { %s28_s18 = sshll.u32 %s161_s17, 4  ;;  %s29_s18 = int_to_ptr.vmem [resolvable:$true] %s28_s18 }
   0x7   :  { %31 = dma.hbm_to_vmem [thread:$0]  %s27_s16, 64, %s29_s18, [#allocation6]  }
   0x8   :  { %154 = dma.done.wait [#allocation3], 64  }
   0x9   :  { %155 = vsyncadd [#allocation3], 4294967232 }
   0xa   :  { %156 = dma.done.wait [#allocation6], 64  }
   0xb   :  { %157 = vsyncadd [#allocation6], 4294967232  ;;  %v40_v0 = vld [vmem:[#allocation2] sm:$0xf]  ;;  %v41_v1 = vld [vmem:[#allocation5] sm:$0xf] }
   0xc   :  { %v42_v2 = vperm.slane %v40_v0, 0  ;;  %v45_v3 = vperm.slane %v40_v0, 1  ;;  %v49_v4 = vperm.slane %v40_v0, 2  ;;  %v53_v5 = vperm.slane %v40_v0, 3  ;;  %s162_s0 = smov [#allocation7]   ;;  %s63_s21 = sshll.u32 %s191_s2, 4  ;;  %s64_s21 = int_to_ptr.hbm [resolvable:$true] %s63_s21 }
   0xd   :  { %s61_s19 = sshll.u32 %s162_s0, 4  ;;  %s163_s22 = smov 64   ;;  %s62_s19 = int_to_ptr.vmem [resolvable:$true] %s61_s19 }
   0xe   :  { %v43_v6 = vadd.f32 %v42_v2, %v41_v1  ;;  %v46_v7 = vadd.f32 %v45_v3, %v41_v1  ;;  %v50_v8 = vadd.f32 %v49_v4, %v41_v1  ;;  %v54_v9 = vadd.f32 %v53_v5, %v41_v1  ;;  %s164_s23 = smov 4  }
  0x10   :  { %44 = vst [vmem:[#allocation7] sm:$0xf] %v43_v6 }
  0x11   :  { %48 = vst [vmem:[#allocation7 + $0x4] sm:$0xf] %v46_v7 }
  0x12   :  { %52 = vst [vmem:[#allocation7 + $0x8] sm:$0xf] %v50_v8 }
  0x13   :  { %56 = vst [vmem:[#allocation7 + $0xc] sm:$0xf] %v54_v9 }
  0x14   :  { %69 = dma.vmem_to_hbm [thread:$0]  %s62_s19, 256, %s64_s21, [#allocation4], %s163_s22, %s163_s22, %s164_s23  }
  0x15   :  { %158 = dma.done.wait [#allocation4], 256  }
  0x16   :  { %159 = vsyncadd [#allocation4], 4294967040 }
  0x17   :  { %74 = vsyncpa [#allocation3], 1 }
  0x18   :  { %75 = vsyncpa [#allocation6], 1 }
  0x19   :  { %76 = vsyncpa [#allocation4], 1 }

</bundles_post_ra>
